<compile_context>
chip_gen: v7x
topology: tpu7x:2x2x1
jax: 0.10.0
libtpu: 0.0.40
codegen_flags: <defaults>
</compile_context>

<pallas_src>
import functools

import jax
import jax.numpy as jnp
from jax.experimental import pallas as pl
from jax.experimental.pallas import tpu as pltpu

F32 = jnp.float32
BF16 = jnp.bfloat16

# ---------------------------------------------------------------------------
# Exact-erf GELU (Abramowitz & Stegun 7.1.26, max abs error ~1.5e-7 in f32)
# ---------------------------------------------------------------------------
_ERF_P = 0.3275911
_ERF_A = (0.254829592, -0.284496736, 1.421413741, -1.453152027, 1.061405429)
_INV_SQRT2 = 0.7071067811865476


def _erf(x):
    s = jnp.where(x >= 0.0, 1.0, -1.0)
    a = jnp.abs(x)
    t = 1.0 / (1.0 + _ERF_P * a)
    a1, a2, a3, a4, a5 = _ERF_A
    poly = t * (a1 + t * (a2 + t * (a3 + t * (a4 + t * a5))))
    return s * (1.0 - poly * jnp.exp(-a * a))


def _gelu_exact(x):
    # nn.GELU() default = exact erf GELU.
    return 0.5 * x * (1.0 + _erf(x * _INV_SQRT2))


# ---------------------------------------------------------------------------
# Fused MLP kernel: one grid step = one (block_m, in) row tile.
# Hidden activation lives entirely in VMEM/vregs.
# ---------------------------------------------------------------------------
def _mlp_kernel(x_ref, w1_ref, b1_ref, w2_ref, b2_ref, o_ref):
    # fc1: MXU matmul, bf16 inputs, f32 accumulation.
    h = jnp.dot(x_ref[...], w1_ref[...], preferred_element_type=jnp.float32)
    h = h + b1_ref[...]                       # f32 bias add (VPU)
    h = _gelu_exact(h)                        # f32 exact GELU (VPU + EUP exp)
    # fc2: cast only at the MXU boundary; accumulate in f32.
    o = jnp.dot(h.astype(w2_ref.dtype), w2_ref[...],
                preferred_element_type=jnp.float32)
    o_ref[...] = (o + b2_ref[...]).astype(o_ref.dtype)


def _round_up(x, m):
    return (x + m - 1) // m * m


@functools.partial(jax.jit, static_argnames=("block_m",))
def mlp_forward(x, w1, b1, w2, b2, *, block_m=256):
    """PerViT Mlp forward: fc2(GELU(fc1(x))).

    x : (..., in_features)
    w1: (in_features, hidden_features)   (i.e. PyTorch fc1.weight.T)
    b1: (hidden_features,)
    w2: (hidden_features, out_features)  (i.e. PyTorch fc2.weight.T)
    b2: (out_features,)
    """
    K = x.shape[-1]
    Hd = w1.shape[1]
    O = w2.shape[1]
    x2 = x.reshape(-1, K)
    M = x2.shape[0]

    # Row tile: multiple of 8 (sublane), capped by block_m; pad rows so the
    # grid divides evenly (padded rows are computed then sliced away).
    bm = min(block_m, _round_up(M, 8))
    Mp = _round_up(M, bm)
    if Mp != M:
        x2 = jnp.pad(x2, ((0, Mp - M), (0, 0)))

    out = pl.pallas_call(
        _mlp_kernel,
        out_shape=jax.ShapeDtypeStruct((Mp, O), F32),
        grid=(Mp // bm,),
        in_specs=[
            pl.BlockSpec((bm, K), lambda i: (i, 0)),   # activations: tiled over rows
            pl.BlockSpec((K, Hd), lambda i: (0, 0)),   # fc1 weight: VMEM-resident
            pl.BlockSpec((1, Hd), lambda i: (0, 0)),   # fc1 bias
            pl.BlockSpec((Hd, O), lambda i: (0, 0)),   # fc2 weight: VMEM-resident
            pl.BlockSpec((1, O), lambda i: (0, 0)),    # fc2 bias
        ],
        out_specs=pl.BlockSpec((bm, O), lambda i: (i, 0)),
        compiler_params=pltpu.CompilerParams(
            dimension_semantics=("parallel",),          # megacore / 2-TC sharding
            vmem_limit_bytes=32 * 1024 * 1024,          # portable to v7x (64 MiB phys)
        ),
    )(
        x2.astype(BF16),                    # bf16 at the MXU boundary
        w1.astype(BF16),
        b1.reshape(1, Hd).astype(F32),      # element-wise math stays f32
        w2.astype(BF16),
        b2.reshape(1, O).astype(F32),
    )
    out = out[:M]
    return out.reshape(x.shape[:-1] + (O,))


def mlp_reference(x, w1, b1, w2, b2):
    """Pure-JAX f32 reference matching the PyTorch module."""
    h = x @ w1 + b1
    h = jax.nn.gelu(h, approximate=False)   # nn.GELU() = exact erf GELU
    return h @ w2 + b2                      # dropout p=0.0 -> identity


if __name__ == "__main__":
    # TODO(synk): nn.Dropout with p > 0 is not implemented (module default drop=0.0 -> identity).
    key = jax.random.PRNGKey(0)
    kx, kw1, kb1, kw2, kb2 = jax.random.split(key, 5)

    # Shapes as PerViT uses the Mlp: token tensor (B, N, C), mlp_ratio = 4.
    B, N, C_in, C_hid, C_out = 2, 64, 32, 128, 32

    x = jax.random.normal(kx, (B, N, C_in), dtype=F32)
    # nn.Linear weights stored transposed (in, out); trunc_normal(std=0.02) ~ normal.
    w1 = (0.02 * jax.random.normal(kw1, (C_in, C_hid))).astype(F32)
    b1 = (0.01 * jax.random.normal(kb1, (C_hid,))).astype(F32)
    w2 = (0.02 * jax.random.normal(kw2, (C_hid, C_out))).astype(F32)
    b2 = (0.01 * jax.random.normal(kb2, (C_out,))).astype(F32)

    out = mlp_forward(x, w1, b1, w2, b2)
    jax.block_until_ready(out)

    ref = mlp_reference(x, w1, b1, w2, b2)
    err = float(jnp.max(jnp.abs(out - ref)))

    assert out.shape == (B, N, C_out), out.shape
    assert bool(jnp.all(jnp.isfinite(out)))
    assert err < 5e-2, f"max abs err {err}"
    print("KERNEL_OK")
</pallas_src>

<mosaic_0001>
module attributes {stable_mosaic.version = 11 : i64} {
  func.func @_mlp_kernel(%arg0: i32, %arg1: memref<128x32xbf16, #tpu.memory_space<vmem>>, %arg2: memref<32x128xbf16, #tpu.memory_space<vmem>>, %arg3: memref<1x128xf32, #tpu.memory_space<vmem>>, %arg4: memref<128x32xbf16, #tpu.memory_space<vmem>>, %arg5: memref<1x32xf32, #tpu.memory_space<vmem>>, %arg6: memref<128x32xf32, #tpu.memory_space<vmem>>) attributes {dimension_semantics = [#tpu.dimension_semantics<parallel>], iteration_bounds = array<i64: 1>, scalar_prefetch = 0 : i64, scratch_operands = 0 : i64, tpu.core_type = #tpu.core_type<tc>, window_params = [{transform_indices = @transform_0, window_bounds = array<i64: 128, 32>}, {pipeline_mode = #tpu.pipeline_mode<synchronous>, transform_indices = @transform_1, window_bounds = array<i64: 32, 128>}, {pipeline_mode = #tpu.pipeline_mode<synchronous>, transform_indices = @transform_2, window_bounds = array<i64: 1, 128>}, {pipeline_mode = #tpu.pipeline_mode<synchronous>, transform_indices = @transform_3, window_bounds = array<i64: 128, 32>}, {pipeline_mode = #tpu.pipeline_mode<synchronous>, transform_indices = @transform_4, window_bounds = array<i64: 1, 32>}, {transform_indices = @transform_5, window_bounds = array<i64: 128, 32>}]} {
    %c0 = arith.constant 0 : index
    %c0_0 = arith.constant 0 : index
    %0 = vector.load %arg1[%c0, %c0_0] : memref<128x32xbf16, #tpu.memory_space<vmem>>, vector<128x32xbf16>
    %c0_1 = arith.constant 0 : index
    %c0_2 = arith.constant 0 : index
    %1 = vector.load %arg2[%c0_1, %c0_2] : memref<32x128xbf16, #tpu.memory_space<vmem>>, vector<32x128xbf16>
    %cst = arith.constant dense<0.000000e+00> : vector<128x128xf32>
    %2 = tpu.matmul %0, %1, %cst {dimension_numbers = #tpu.dot_dimension_numbers<[1], [0], [0], [1], [0, 0, 1, 1], [], []>} : vector<128x32xbf16>, vector<32x128xbf16>, vector<128x128xf32> -> vector<128x128xf32>
    %c0_3 = arith.constant 0 : index
    %c0_4 = arith.constant 0 : index
    %3 = vector.load %arg3[%c0_3, %c0_4] : memref<1x128xf32, #tpu.memory_space<vmem>>, vector<1x128xf32>
    %4 = vector.broadcast %3 : vector<1x128xf32> to vector<128x128xf32>
    %5 = arith.addf %2, %4 : vector<128x128xf32>
    %cst_5 = arith.constant 5.000000e-01 : f32
    %6 = vector.broadcast %cst_5 : f32 to vector<128x128xf32>
    %7 = arith.mulf %6, %5 : vector<128x128xf32>
    %cst_6 = arith.constant 0.707106769 : f32
    %8 = vector.broadcast %cst_6 : f32 to vector<128x128xf32>
    %9 = arith.mulf %5, %8 : vector<128x128xf32>
    %cst_7 = arith.constant 0.000000e+00 : f32
    %10 = vector.broadcast %cst_7 : f32 to vector<128x128xf32>
    %11 = arith.cmpf oge, %9, %10 : vector<128x128xf32>
    %cst_8 = arith.constant 1.000000e+00 : f32
    %cst_9 = arith.constant -1.000000e+00 : f32
    %12 = vector.broadcast %cst_8 : f32 to vector<128x128xf32>
    %13 = vector.broadcast %cst_9 : f32 to vector<128x128xf32>
    %14 = arith.select %11, %12, %13 : vector<128x128xi1>, vector<128x128xf32>
    %15 = math.absf %9 : vector<128x128xf32>
    %cst_10 = arith.constant 0.327591091 : f32
    %16 = vector.broadcast %cst_10 : f32 to vector<128x128xf32>
    %17 = arith.mulf %16, %15 : vector<128x128xf32>
    %cst_11 = arith.constant 1.000000e+00 : f32
    %18 = vector.broadcast %cst_11 : f32 to vector<128x128xf32>
    %19 = arith.addf %18, %17 : vector<128x128xf32>
    %cst_12 = arith.constant 1.000000e+00 : f32
    %20 = vector.broadcast %cst_12 : f32 to vector<128x128xf32>
    %21 = arith.divf %20, %19 : vector<128x128xf32>
    %cst_13 = arith.constant 1.06140542 : f32
    %22 = vector.broadcast %cst_13 : f32 to vector<128x128xf32>
    %23 = arith.mulf %21, %22 : vector<128x128xf32>
    %cst_14 = arith.constant -1.45315206 : f32
    %24 = vector.broadcast %cst_14 : f32 to vector<128x128xf32>
    %25 = arith.addf %24, %23 : vector<128x128xf32>
    %26 = arith.mulf %21, %25 : vector<128x128xf32>
    %cst_15 = arith.constant 1.42141378 : f32
    %27 = vector.broadcast %cst_15 : f32 to vector<128x128xf32>
    %28 = arith.addf %27, %26 : vector<128x128xf32>
    %29 = arith.mulf %21, %28 : vector<128x128xf32>
    %cst_16 = arith.constant -0.284496725 : f32
    %30 = vector.broadcast %cst_16 : f32 to vector<128x128xf32>
    %31 = arith.addf %30, %29 : vector<128x128xf32>
    %32 = arith.mulf %21, %31 : vector<128x128xf32>
    %cst_17 = arith.constant 0.254829586 : f32
    %33 = vector.broadcast %cst_17 : f32 to vector<128x128xf32>
    %34 = arith.addf %33, %32 : vector<128x128xf32>
    %35 = arith.mulf %21, %34 : vector<128x128xf32>
    %cst_18 = arith.constant 0.000000e+00 : f32
    %36 = vector.broadcast %cst_18 : f32 to vector<128x128xf32>
    %37 = arith.subf %36, %15 : vector<128x128xf32>
    %38 = arith.mulf %37, %15 : vector<128x128xf32>
    %39 = math.exp %38 : vector<128x128xf32>
    %40 = arith.mulf %35, %39 : vector<128x128xf32>
    %cst_19 = arith.constant 1.000000e+00 : f32
    %41 = vector.broadcast %cst_19 : f32 to vector<128x128xf32>
    %42 = arith.subf %41, %40 : vector<128x128xf32>
    %43 = arith.mulf %14, %42 : vector<128x128xf32>
    %cst_20 = arith.constant 1.000000e+00 : f32
    %44 = vector.broadcast %cst_20 : f32 to vector<128x128xf32>
    %45 = arith.addf %44, %43 : vector<128x128xf32>
    %46 = arith.mulf %7, %45 : vector<128x128xf32>
    %47 = arith.truncf %46 : vector<128x128xf32> to vector<128x128xbf16>
    %c0_21 = arith.constant 0 : index
    %c0_22 = arith.constant 0 : index
    %48 = vector.load %arg4[%c0_21, %c0_22] : memref<128x32xbf16, #tpu.memory_space<vmem>>, vector<128x32xbf16>
    %cst_23 = arith.constant dense<0.000000e+00> : vector<128x32xf32>
    %49 = tpu.matmul %47, %48, %cst_23 {dimension_numbers = #tpu.dot_dimension_numbers<[1], [0], [0], [1], [0, 0, 1, 1], [], []>} : vector<128x128xbf16>, vector<128x32xbf16>, vector<128x32xf32> -> vector<128x32xf32>
    %c0_24 = arith.constant 0 : index
    %c0_25 = arith.constant 0 : index
    %50 = vector.load %arg5[%c0_24, %c0_25] : memref<1x32xf32, #tpu.memory_space<vmem>>, vector<1x32xf32>
    %51 = vector.broadcast %50 : vector<1x32xf32> to vector<128x32xf32>
    %52 = arith.addf %49, %51 : vector<128x32xf32>
    %c0_26 = arith.constant 0 : index
    %c0_27 = arith.constant 0 : index
    %53 = vector.load %arg6[%c0_26, %c0_27] : memref<128x32xf32, #tpu.memory_space<vmem>>, vector<128x32xf32>
    tpu.vector_store %arg6[%c0_26, %c0_27], %52 {strides = array<i32>} : memref<128x32xf32, #tpu.memory_space<vmem>>, vector<128x32xf32>,
    return
  }
  func.func @transform_0(%arg0: i32) -> (i32, i32) {
    %c0_i32 = arith.constant 0 : i32
    %c0_i32_0 = arith.constant 0 : i32
    return %arg0, %c0_i32 : i32, i32
  }
  func.func @transform_1(%arg0: i32) -> (i32, i32) {
    %c0_i32 = arith.constant 0 : i32
    %c0_i32_0 = arith.constant 0 : i32
    %c0_i32_1 = arith.constant 0 : i32
    return %c0_i32, %c0_i32_0 : i32, i32
  }
  func.func @transform_2(%arg0: i32) -> (i32, i32) {
    %c0_i32 = arith.constant 0 : i32
    %c0_i32_0 = arith.constant 0 : i32
    %c0_i32_1 = arith.constant 0 : i32
    return %c0_i32, %c0_i32_0 : i32, i32
  }
  func.func @transform_3(%arg0: i32) -> (i32, i32) {
    %c0_i32 = arith.constant 0 : i32
    %c0_i32_0 = arith.constant 0 : i32
    %c0_i32_1 = arith.constant 0 : i32
    return %c0_i32, %c0_i32_0 : i32, i32
  }
  func.func @transform_4(%arg0: i32) -> (i32, i32) {
    %c0_i32 = arith.constant 0 : i32
    %c0_i32_0 = arith.constant 0 : i32
    %c0_i32_1 = arith.constant 0 : i32
    return %c0_i32, %c0_i32_0 : i32, i32
  }
  func.func @transform_5(%arg0: i32) -> (i32, i32) {
    %c0_i32 = arith.constant 0 : i32
    %c0_i32_0 = arith.constant 0 : i32
    return %arg0, %c0_i32 : i32, i32
  }
}

</mosaic_0001>

<bundles_post_ra>
// kernel: mlp_forward.1
= control target key start
LH: loop header
LB: loop body
LE: loop exit
PB: predicated region body
PF: predicated region fallthrough
CT: control target
= control target key end

     0   :  { %vm100_vm0 = vcmask 261120   ;;  %s1621_s1 = inlined_call_operand.vmem [shape: bf16[32,128], index: 1, kind: input, shape index: {}]   ;;  %s1622_s0 = inlined_call_operand.vmem [shape: bf16[128,32], index: 0, kind: input, shape index: {}]   ;;  %s1623_s3 = inlined_call_operand.vmem [shape: bf16[128,32], index: 3, kind: input, shape index: {}]   ;;  %s1624_s2 = inlined_call_operand.vmem [shape: f32[1,128], index: 2, kind: input, shape index: {}]   ;;  %s1625_s4 = inlined_call_operand.vmem [shape: f32[1,32], index: 4, kind: input, shape index: {}]   ;;  %s1626_s5 = inlined_call_operand.vmem [shape: f32[128,32], index: 5, kind: output, shape index: {}]  }
   0x1   :  { %v973_v0 = vld [vmem:[%s1621_s1] sm:$0xff]   ;;  %v974_v1 = vld [vmem:[%s1621_s1 + $0x8] sm:$0xff]   ;;  %v977_v4 = vld [vmem:[%s1622_s0 + $0x10] sm:$0xff]  }
   0x2   :  { %904 = vmatprep.subr.bf16.mxu0 %v973_v0  ;;  %v975_v2 = vld [vmem:[%s1622_s0] sm:$0xff]   ;;  %v976_v3 = vld [vmem:[%s1622_s0 + $0x8] sm:$0xff]   ;;  %v978_v5 = vld [vmem:[%s1622_s0 + $0x18] sm:$0xff]  }
   0x3   :  { %905 = vmatpush3.bf16.msra.mxu0 %v973_v0  ;;  %908 = vmatprep.mubr.msk.bf16.mxu0 %vm100_vm0, %v975_v2  ;;  %v979_v6 = vld [vmem:[%s1622_s0 + $0x20] sm:$0xff]   ;;  %v980_v7 = vld [vmem:[%s1622_s0 + $0x28] sm:$0xff]   ;;  %v981_v8 = vld [vmem:[%s1622_s0 + $0x30] sm:$0xff]  }
   0x4   :  { %906 = vmatprep.subr.bf16.mxu0 %v974_v1  ;;  %v982_v9 = vld [vmem:[%s1622_s0 + $0x38] sm:$0xff]   ;;  %v983_v10 = vld [vmem:[%s1623_s3] sm:$0xff]   ;;  %v984_v11 = vld [vmem:[%s1623_s3 + $0x8] sm:$0xff]  }
   0x5   :  { %956 = vmatprep.subr.bf16.mxu1 %v983_v10  ;;  %v985_v12 = vld [vmem:[%s1623_s3 + $0x10] sm:$0xff]   ;;  %v986_v13 = vld [vmem:[%s1623_s3 + $0x18] sm:$0xff]   ;;  %v987_v14 = vld [vmem:[%s1623_s3 + $0x20] sm:$0xff]  }
   0x6   :  { %964 = vmatpush3.bf16.msra.mxu1 %v983_v10  ;;  %v988_v15 = vld [vmem:[%s1623_s3 + $0x28] sm:$0xff]   ;;  %v989_v16 = vld [vmem:[%s1623_s3 + $0x30] sm:$0xff]   ;;  %v990_v17 = vld [vmem:[%s1623_s3 + $0x38] sm:$0xff]  }
   0x7   :  { %907 = vmatpush3.bf16.msra.mxu0 %v974_v1  ;;  %957 = vmatprep.subr.bf16.mxu1 %v984_v11  ;;  %v1151_v18 = vld [vmem:[%s1624_s2] ss:$0 sm:$0xff] }
   0x8   :  { %924 = vmatprep.subr.bf16.mxu0 %v983_v10 }
   0xa   :  { %909 = vmatmul.mubr.msk.bf16.vlgmr.msra.gmra.mrb[0].mxu0 %vm100_vm0, %v976_v3  ;;  %965 = vmatpush3.bf16.msra.mxu1 %v984_v11 }
   0xb   :  { %912 = vmatprep.mubr.msk.bf16.mxu0 %vm100_vm0, %v977_v4  ;;  %925 = vmatpush3.bf16.msra.mxu0 %v983_v10 }
   0xc   :  { %926 = vmatprep.subr.bf16.mxu0 %v984_v11  ;;  %958 = vmatprep.subr.bf16.mxu1 %v985_v12 }
   0xe   :  { %966 = vmatpush3.bf16.msra.mxu1 %v985_v12 }
   0xf   :  { %927 = vmatpush3.bf16.msra.mxu0 %v984_v11  ;;  %959 = vmatprep.subr.bf16.mxu1 %v986_v13 }
  0x10   :  { %928 = vmatprep.subr.bf16.mxu0 %v985_v12 }
  0x12   :  { %913 = vmatmul.mubr.msk.bf16.gmra.mrb[4].mxu0 %vm100_vm0, %v978_v5  ;;  %967 = vmatpush3.bf16.msra.mxu1 %v986_v13  ;;  %v1055_v5 = vmov -1.0  }
  0x13   :  { %916 = vmatprep.mubr.msk.bf16.mxu0 %vm100_vm0, %v979_v6  ;;  %929 = vmatpush3.bf16.msra.mxu0 %v985_v12 }
  0x14   :  { %930 = vmatprep.subr.bf16.mxu0 %v986_v13  ;;  %960 = vmatprep.subr.bf16.mxu1 %v987_v14 }
  0x16   :  { %968 = vmatpush3.bf16.msra.mxu1 %v987_v14 }
  0x17   :  { %931 = vmatpush3.bf16.msra.mxu0 %v986_v13  ;;  %961 = vmatprep.subr.bf16.mxu1 %v988_v15 }
  0x18   :  { %932 = vmatprep.subr.bf16.mxu0 %v987_v14 }
  0x1a   :  { %917 = vmatmul.mubr.msk.bf16.gmra.mrb[8].mxu0 %vm100_vm0, %v980_v7  ;;  %969 = vmatpush3.bf16.msra.mxu1 %v988_v15 }
  0x1b   :  { %920 = vmatprep.mubr.msk.bf16.mxu0 %vm100_vm0, %v981_v8  ;;  %933 = vmatpush3.bf16.msra.mxu0 %v987_v14 }
  0x1c   :  { %934 = vmatprep.subr.bf16.mxu0 %v988_v15  ;;  %962 = vmatprep.subr.bf16.mxu1 %v989_v16 }
  0x1e   :  { %970 = vmatpush3.bf16.msra.mxu1 %v989_v16 }
  0x1f   :  { %935 = vmatpush3.bf16.msra.mxu0 %v988_v15  ;;  %963 = vmatprep.subr.bf16.mxu1 %v990_v17 }
  0x20   :  { %936 = vmatprep.subr.bf16.mxu0 %v989_v16 }
  0x22   :  { %921 = vmatmul.mubr.msk.bf16.gmra.mrb[12].mxu0 %vm100_vm0, %v982_v9  ;;  %971 = vmatpush3.bf16.msra.mxu1 %v990_v17 }
  0x23   :  { %937 = vmatpush3.bf16.msra.mxu0 %v989_v16 }
  0x24   :  { %938 = vmatprep.subr.bf16.mxu0 %v990_v17 }
  0x27   :  { %939 = vmatpush3.bf16.msra.mxu0 %v990_v17 }
  0xdd   :  { %v910_v19 = vpop.f32.mrb[0].mxu0 }
  0xde   :  { %v168_v20 = vadd.f32 %v910_v19, %v1151_v18  ;;  %v159_v21 = vpop.f32.mrb[1].mxu0 }
  0xdf   :  { %v160_v22 = vadd.f32 %v1151_v18, %v159_v21  ;;  %v911_v23 = vpop.f32.mrb[2].mxu0 }
  0xe0   :  { %v240_v24 = vmul.f32 0.70710677, %v168_v20  ;;  %v171_v25 = vadd.f32 %v911_v23, %v1151_v18  ;;  %v162_v26 = vpop.f32.mrb[3].mxu0  ;;  %v1172_v54 = vmul.f32 0.5, %v168_v20 }
  0xe1   :  { %v1156_v27 = vmul.f32 0.70710677, %v160_v22  ;;  %v163_v30 = vadd.f32 %v1151_v18, %v162_v26  ;;  %v1186_v0 = vmul.f32 0.5, %v160_v22 }
  0xe2   :  { %v288_v28 = vand.u32 2147483647, %v240_v24  ;;  %v1158_v29 = vmul.f32 0.70710677, %v171_v25  ;;  %vm256_vm1 = vcmp.ge.f32.partialorder %v240_v24, 0.0  ;;  %v1188_v2 = vmul.f32 0.5, %v171_v25 }
  0xe3   :  { %v286_v31 = vand.u32 2147483647, %v1156_v27  ;;  %v1163_v37 = vmul.f32 0.70710677, %v163_v30  ;;  %v1196_v6 = vsel %vm256_vm1, 1.0, %v1055_v5  ;;  %vm254_vm2 = vcmp.ge.f32.partialorder %v1156_v27, 0.0 }
  0xe4   :  { %v304_v32 = vmul.f32 0.3275911, %v288_v28  ;;  %v289_v34 = vand.u32 2147483647, %v1158_v29  ;;  %v512_v36 = vsub.f32 0.0, %v288_v28  ;;  %vm257_vm3 = vcmp.ge.f32.partialorder %v1158_v29, 0.0 }
  0xe5   :  { %v302_v33 = vmul.f32 0.3275911, %v286_v31  ;;  %v914_v38 = vpop.f32.mrb[4].mxu0  ;;  %v510_v42 = vsub.f32 0.0, %v286_v31  ;;  %v287_v43 = vand.u32 2147483647, %v1163_v37 }
  0xe6   :  { %v320_v35 = vadd.f32 1.0, %v304_v32  ;;  %v305_v40 = vmul.f32 0.3275911, %v289_v34  ;;  %v175_v41 = vpop.f32.mrb[5].mxu0  ;;  %v528_v47 = vmul.f32 %v512_v36, %v288_v28  ;;  %v513_v48 = vsub.f32 0.0, %v289_v34 }
  0xe7   :  { %v318_v39 = vadd.f32 1.0, %v302_v33  ;;  %v915_v44 = vpop.f32.mrb[6].mxu0  ;;  %v303_v49 = vmul.f32 0.3275911, %v287_v43  ;;  %v184_v50 = vadd.f32 %v914_v38, %v1151_v18  ;;  %v526_v51 = vmul.f32 %v510_v42, %v286_v31 }
  0xe8   :  { %991 = vrcp.f32 %v320_v35  ;;  %v321_v45 = vadd.f32 1.0, %v305_v40  ;;  %v1166_v46 = vpop.f32.mrb[7].mxu0  ;;  %v1170_v53 = vadd.f32 %v915_v44, %v1151_v18  ;;  %v546_v57 = vmul.f32 1.442695, %v528_v47 }
  0xe9   :  { %993 = vrcp.f32 %v318_v39  ;;  %v319_v52 = vadd.f32 1.0, %v303_v49  ;;  %v1174_v55 = vmul.f32 0.70710677, %v184_v50  ;;  %v529_v58 = vmul.f32 %v513_v48, %v289_v34 }
  0xea   :  { %995 = vrcp.f32 %v321_v45  ;;  %v511_v60 = vsub.f32 0.0, %v287_v43  ;;  %v1182_v62 = vmul.f32 0.70710677, %v1170_v53  ;;  %v542_v1 = vmul.f32 1.442695, %v526_v51 }
  0xeb   :  { %997 = vrcp.f32 %v319_v52  ;;  %v1179_v61 = vand.u32 2147483647, %v1174_v55  ;;  %v1191_v3 = vadd.f32 %v1151_v18, %v175_v41  ;;  %v548_v10 = vmul.f32 1.442695, %v529_v58 }
  0xec   :  { %v1201_v8 = vand.u32 2147483647, %v1182_v62  ;;  %999 = vpow2.f32 %v546_v57  ;;  %vm255_vm4 = vcmp.ge.f32.partialorder %v1163_v37, 0.0  ;;  %v527_v13 = vmul.f32 %v511_v60, %v287_v43 }
  0xed   :  { %v918_v56 = vpop.f32.mrb[8].mxu0  ;;  %v308_v7 = vmul.f32 0.3275911, %v1179_v61  ;;  %1001 = vpow2.f32 %v542_v1  ;;  %v1212_v17 = vmul.f32 0.5, %v163_v30  ;;  %v1215_v19 = vmul.f32 0.70710677, %v1191_v3 }
  0xee   :  { %v1176_v59 = vpop.f32.mrb[9].mxu0  ;;  %v309_v15 = vmul.f32 0.3275911, %v1201_v8  ;;  %v1220_v21 = vsel %vm254_vm2, 1.0, %v1055_v5  ;;  %v1229_v26 = vsel %vm257_vm3, 1.0, %v1055_v5  ;;  %v1234_v28 = vsel %vm255_vm4, 1.0, %v1055_v5 }
  0xef   :  { %v1184_v63 = vpop.f32.mrb[10].mxu0  ;;  %v324_v14 = vadd.f32 1.0, %v308_v7  ;;  %v544_v32 = vmul.f32 1.442695, %v527_v13  ;;  %v1240_v33 = vmul.f32 0.5, %v184_v50  ;;  %vm260_vm5 = vcmp.ge.f32.partialorder %v1174_v55, 0.0 }
  0xf0   :  { %v1193_v4 = vpop.f32.mrb[11].mxu0  ;;  %v325_v22 = vadd.f32 1.0, %v309_v15  ;;  %v290_v36 = vand.u32 2147483647, %v1215_v19  ;;  %v1250_v37 = vadd.f32 %v918_v56, %v1151_v18  ;;  %v516_v43 = vsub.f32 0.0, %v1179_v61 }
  0xf1   :  { %1003 = vrcp.f32 %v324_v14  ;;  %v1257_v44 = vmul.f32 0.5, %v1170_v53  ;;  %v1261_v45 = vadd.f32 %v1151_v18, %v1166_v46  ;;  %v1269_v52 = vsel %vm260_vm5, 1.0, %v1055_v5 }
  0xf2   :  { %v1203_v9 = vpop.eup %991  ;;  %1005 = vpow2.f32 %v548_v10  ;;  %v306_v53 = vmul.f32 0.3275911, %v290_v36  ;;  %v514_v56 = vsub.f32 0.0, %v290_v36  ;;  %v1273_v60 = vmul.f32 0.70710677, %v1250_v37 }
  0xf3   :  { %v1207_v11 = vpop.eup %993  ;;  %v368_v12 = vmul.f32 1.0614054, %v1203_v9  ;;  %1007 = vrcp.f32 %v325_v22  ;;  %v532_v10 = vmul.f32 %v516_v43, %v1179_v61  ;;  %v1278_v13 = vmul.f32 0.70710677, %v1261_v45 }
  0xf4   :  { %v366_v16 = vmul.f32 1.0614054, %v1207_v11  ;;  %v1224_v24 = vpop.eup %995  ;;  %1009 = vpow2.f32 %v544_v32  ;;  %vm261_vm6 = vcmp.ge.f32.partialorder %v1182_v62, 0.0  ;;  %v322_v61 = vadd.f32 1.0, %v306_v53 }
  0xf5   :  { %v384_v20 = vadd.f32 -1.4531521, %v368_v12  ;;  %v1222_v23 = vpop.f32.mrb[12].mxu0  ;;  %v369_v31 = vmul.f32 1.0614054, %v1224_v24  ;;  %v1244_v29 = vpop.eup %997  ;;  %v517_v12 = vsub.f32 0.0, %v1201_v8 }
  0xf6   :  { %v382_v25 = vadd.f32 -1.4531521, %v366_v16  ;;  %v1236_v27 = vpop.f32.mrb[13].mxu0  ;;  %v367_v41 = vmul.f32 1.0614054, %v1244_v29  ;;  %v1000_v50 = vpop.eup %999  ;;  %vm264_vm7 = vcmp.ge.f32.partialorder %v1273_v60, 0.0 }
  0xf7   :  { %v400_v30 = vmul.f32 %v1203_v9, %v384_v20  ;;  %v1242_v34 = vpop.f32.mrb[14].mxu0  ;;  %v385_v40 = vadd.f32 -1.4531521, %v369_v31  ;;  %v1002_v1 = vpop.eup %1001  ;;  %v291_v43 = vand.u32 2147483647, %v1278_v13  ;;  %vm258_vm11 = vcmp.ge.f32.partialorder %v1215_v19, 0.0 }
  0xf8   :  { %v398_v35 = vmul.f32 %v1207_v11, %v382_v25  ;;  %v1252_v38 = vpop.f32.mrb[15].mxu0  ;;  %v383_v49 = vadd.f32 -1.4531521, %v367_v41  ;;  %v554_v41 = vmul.f32 1.442695, %v532_v10  ;;  %vm259_vm12 = vcmp.ge.f32.partialorder %v1278_v13, 0.0 }
  0xf9   :  { %v416_v39 = vadd.f32 1.4214138, %v400_v30  ;;  %v401_v48 = vmul.f32 %v1224_v24, %v385_v40  ;;  %v530_v30 = vmul.f32 %v514_v56, %v290_v36 }
  0xfa   :  { %v414_v42 = vadd.f32 1.4214138, %v398_v35  ;;  %v399_v46 = vmul.f32 %v1244_v29, %v383_v49  ;;  %1011 = vpow2.f32 %v554_v41 }
  0xfb   :  { %v432_v47 = vmul.f32 %v1203_v9, %v416_v39  ;;  %v417_v58 = vadd.f32 1.4214138, %v401_v48  ;;  %v1280_v55 = vpop.eup %1003  ;;  %v1289_v39 = vand.u32 2147483647, %v1273_v60 }
  0xfc   :  { %v430_v51 = vmul.f32 %v1207_v11, %v414_v42  ;;  %v415_v16 = vadd.f32 1.4214138, %v399_v46  ;;  %v1006_v20 = vpop.eup %1005  ;;  %v372_v25 = vmul.f32 1.0614054, %v1280_v55  ;;  %v533_v42 = vmul.f32 %v517_v12, %v1201_v8 }
  0xfd   :  { %v448_v57 = vadd.f32 -0.28449672, %v432_v47  ;;  %v433_v15 = vmul.f32 %v1224_v24, %v417_v58  ;;  %v1293_v47 = vpop.eup %1007  ;;  %v1302_v58 = vadd.f32 %v1151_v18, %v1176_v59 }
  0xfe   :  { %v446_v7 = vadd.f32 -0.28449672, %v430_v51  ;;  %v431_v35 = vmul.f32 %v1244_v29, %v415_v16  ;;  %v388_v40 = vadd.f32 -1.4531521, %v372_v25  ;;  %v312_v51 = vmul.f32 0.3275911, %v1289_v39  ;;  %v1010_v8 = vpop.eup %1009 }
  0xff   :  { %v464_v14 = vmul.f32 %v1203_v9, %v448_v57  ;;  %v449_v32 = vadd.f32 -0.28449672, %v433_v15  ;;  %v373_v57 = vmul.f32 1.0614054, %v1293_v47  ;;  %v1311_v41 = vmul.f32 0.70710677, %v1302_v58 }
 0x100   :  { %v462_v22 = vmul.f32 %v1207_v11, %v446_v7  ;;  %v447_v36 = vadd.f32 -0.28449672, %v431_v35  ;;  %v404_v56 = vmul.f32 %v1280_v55, %v388_v40 }
 0x101   :  { %v480_v31 = vadd.f32 0.2548296, %v464_v14  ;;  %v465_v49 = vmul.f32 %v1224_v24, %v449_v32  ;;  %v550_v14 = vmul.f32 1.442695, %v530_v30  ;;  %v389_v15 = vadd.f32 -1.4531521, %v373_v57 }
 0x102   :  { %v478_v53 = vadd.f32 0.2548296, %v462_v22  ;;  %v463_v10 = vmul.f32 %v1244_v29, %v447_v36  ;;  %v420_v12 = vadd.f32 1.4214138, %v404_v56  ;;  %v294_v62 = vand.u32 2147483647, %v1311_v41 }
 0x103   :  { %v496_v48 = vmul.f32 %v1203_v9, %v480_v31  ;;  %v481_v7 = vadd.f32 0.2548296, %v465_v49  ;;  %v328_v9 = vadd.f32 1.0, %v312_v51  ;;  %v405_v32 = vmul.f32 %v1293_v47, %v389_v15 }
 0x104   :  { %v479_v25 = vadd.f32 0.2548296, %v463_v10  ;;  %v494_v31 = vmul.f32 %v1207_v11, %v478_v53  ;;  %v436_v59 = vmul.f32 %v1280_v55, %v420_v12  ;;  %v310_v12 = vmul.f32 0.3275911, %v294_v62 }
 0x105   :  { %v576_v46 = vmul.f32 %v1000_v50, %v496_v48  ;;  %v497_v22 = vmul.f32 %v1224_v24, %v481_v7  ;;  %1013 = vrcp.f32 %v328_v9  ;;  %v556_v50 = vmul.f32 1.442695, %v533_v42 }
 0x106   :  { %v515_v48 = vsub.f32 0.0, %v291_v43  ;;  %v452_v30 = vadd.f32 -0.28449672, %v436_v59  ;;  %1015 = vrcp.f32 %v322_v61  ;;  %v1316_v24 = vsel %vm261_vm6, 1.0, %v1055_v5 }
 0x107   :  { %v592_v16 = vsub.f32 1.0, %v576_v46  ;;  %v577_v40 = vmul.f32 %v1006_v20, %v497_v22  ;;  %v421_v11 = vadd.f32 1.4214138, %v405_v32  ;;  %v495_v36 = vmul.f32 %v1244_v29, %v479_v25 }
 0x108   :  { %1017 = vpow2.f32 %v550_v14  ;;  %v307_v42 = vmul.f32 0.3275911, %v291_v43  ;;  %v574_v51 = vmul.f32 %v1002_v1, %v494_v31  ;;  %v531_v56 = vmul.f32 %v515_v48, %v291_v43  ;;  %v1012_v14 = vpop.eup %1011 }
 0x109   :  { %v608_v35 = vmul.f32 %v592_v16, %v1196_v6  ;;  %v593_v49 = vsub.f32 1.0, %v577_v40  ;;  %v468_v6 = vmul.f32 %v1280_v55, %v452_v30  ;;  %v437_v20 = vmul.f32 %v1293_v47, %v421_v11 }
 0x10a   :  { %1019 = vpow2.f32 %v556_v50  ;;  %v520_v7 = vsub.f32 0.0, %v1289_v39  ;;  %v1326_v29 = vadd.f32 %v1184_v63, %v1151_v18  ;;  %v575_v10 = vmul.f32 %v1010_v8, %v495_v36 }
 0x10b   :  { %v624_v53 = vadd.f32 1.0, %v608_v35  ;;  %v609_v61 = vmul.f32 %v593_v49, %v1229_v26  ;;  %v484_v57 = vadd.f32 0.2548296, %v468_v6  ;;  %v453_v46 = vadd.f32 -0.28449672, %v437_v20 }
 0x10c   :  { %v323_v9 = vadd.f32 1.0, %v307_v42  ;;  %v590_v15 = vsub.f32 1.0, %v574_v51  ;;  %v326_v25 = vadd.f32 1.0, %v310_v12  ;;  %v1340_v8 = vmul.f32 0.70710677, %v1326_v29 }
 0x10d   :  { %v625_v1 = vadd.f32 1.0, %v609_v61  ;;  %v500_v16 = vmul.f32 %v1280_v55, %v484_v57  ;;  %v469_v26 = vmul.f32 %v1293_v47, %v453_v46  ;;  %v1334_v22 = vmul.f32 %v624_v53, %v1172_v54 }
 0x10e   :  { %v552_v31 = vmul.f32 1.442695, %v531_v56  ;;  %v1343_v59 = vmul.f32 0.5, %v1250_v37  ;;  %v536_v32 = vmul.f32 %v520_v7, %v1289_v39  ;;  %v591_v54 = vsub.f32 1.0, %v575_v10 }
 0x10f   :  { %v1331_v43 = vpop.eup %1013  ;;  %v1337_v63 = vmul.f32 %v625_v1, %v1188_v2  ;;  %v580_v35 = vmul.f32 %v1012_v14, %v500_v16  ;;  %1021 = vrcp.f32 %v326_v25  ;;  %v606_v40 = vmul.f32 %v590_v15, %v1220_v21 }
 0x110   :  { %v376_v55 = vmul.f32 1.0614054, %v1331_v43  ;;  %v1349_v2 = vpop.eup %1015  ;;  %v485_v48 = vadd.f32 0.2548296, %v469_v26  ;;  %v1355_v37 = vsel %vm264_vm7, 1.0, %v1055_v5  ;;  %1023 = vrcp.f32 %v323_v9 }
 0x111   :  { %v655_v50 = vpack.c.bf16 %v1337_v63, %v1334_v22  ;;  %v518_v39 = vsub.f32 0.0, %v294_v62  ;;  %v297_v49 = vand.u32 2147483647, %v1340_v8  ;;  %v1362_v36 = vadd.f32 %v1151_v18, %v1193_v4 }
 0x112   :  { %v392_v30 = vadd.f32 -1.4531521, %v376_v55  ;;  %v1357_v11 = vpop.eup %1017  ;;  %1025 = vpow2.f32 %v552_v31  ;;  %v562_v51 = vmul.f32 1.442695, %v536_v32  ;;  %vm262_vm8 = vcmp.ge.f32.partialorder %v1311_v41, 0.0 }
 0x113   :  { %v607_v60 = vmul.f32 %v591_v54, %v1234_v28  ;;  %v596_v6 = vsub.f32 1.0, %v580_v35  ;;  %v313_v20 = vmul.f32 0.3275911, %v297_v49  ;;  %v1368_v53 = vmul.f32 0.70710677, %v1362_v36 }
 0x114   :  { %v1020_v42 = vpop.eup %1019  ;;  %v408_v21 = vmul.f32 %v1331_v43, %v392_v30  ;;  %v622_v61 = vadd.f32 1.0, %v606_v40  ;;  %v501_v56 = vmul.f32 %v1293_v47, %v485_v48  ;;  %v1373_v4 = vadd.f32 %v1222_v23, %v1151_v18 }
 0x115   :  { %v1376_v46 = vmul.f32 0.5, %v1302_v58  ;;  %v534_v7 = vmul.f32 %v518_v39, %v294_v62  ;;  %v329_v41 = vadd.f32 1.0, %v313_v20  ;;  %v295_v28 = vand.u32 2147483647, %v1368_v53 }
 0x116   :  { %v424_v57 = vadd.f32 1.4214138, %v408_v21  ;;  %1027 = vpow2.f32 %v562_v51  ;;  %v1381_v10 = vsel %vm262_vm8, 1.0, %v1055_v5  ;;  %v1385_v47 = vadd.f32 %v1151_v18, %v1236_v27 }
 0x117   :  { %v623_v9 = vadd.f32 1.0, %v607_v60  ;;  %v612_v23 = vmul.f32 %v596_v6, %v1269_v52  ;;  %1029 = vrcp.f32 %v329_v41  ;;  %v311_v58 = vmul.f32 0.3275911, %v295_v28 }
 0x118   :  { %v440_v1 = vmul.f32 %v1331_v43, %v424_v57  ;;  %v1389_v62 = vmul.f32 %v622_v61, %v1186_v0  ;;  %v581_v12 = vmul.f32 %v1020_v42, %v501_v56  ;;  %v1392_v15 = vmul.f32 0.70710677, %v1373_v4 }
 0x119   :  { %v1394_v16 = vpop.eup %1021  ;;  %v558_v26 = vmul.f32 1.442695, %v534_v7  ;;  %v1397_v25 = vmul.f32 0.5, %v1326_v29  ;;  %v521_v27 = vsub.f32 0.0, %v297_v49  ;;  %v327_v31 = vadd.f32 1.0, %v311_v58 }
 0x11a   :  { %v456_v14 = vadd.f32 -0.28449672, %v440_v1  ;;  %v374_v55 = vmul.f32 1.0614054, %v1394_v16  ;;  %vm265_vm9 = vcmp.ge.f32.partialorder %v1340_v8, 0.0  ;;  %v1405_v32 = vpop.eup %1023  ;;  %v1408_v54 = vmul.f32 %v623_v9, %v1212_v17 }
 0x11b   :  { %v1403_v0 = vmul.f32 0.70710677, %v1385_v47  ;;  %v628_v35 = vadd.f32 1.0, %v612_v23  ;;  %1031 = vrcp.f32 %v327_v31  ;;  %v300_v29 = vand.u32 2147483647, %v1392_v15 }
 0x11c   :  { %v472_v52 = vmul.f32 %v1331_v43, %v456_v14  ;;  %v1411_v40 = vpop.eup %1025  ;;  %v597_v48 = vsub.f32 1.0, %v581_v12  ;;  %v390_v39 = vadd.f32 -1.4531521, %v374_v55  ;;  %v1415_v8 = vadd.f32 %v1242_v34, %v1151_v18 }
 0x11d   :  { %1033 = vpow2.f32 %v558_v26  ;;  %v1418_v42 = vsel %vm265_vm9, 1.0, %v1055_v5  ;;  %v537_v21 = vmul.f32 %v521_v27, %v297_v49  ;;  %v316_v17 = vmul.f32 0.3275911, %v300_v29 }
 0x11e   :  { %v488_v30 = vadd.f32 0.2548296, %v472_v52  ;;  %v406_v60 = vmul.f32 %v1394_v16, %v390_v39  ;;  %v519_v6 = vsub.f32 0.0, %v295_v28  ;;  %v298_v20 = vand.u32 2147483647, %v1403_v0 }
 0x11f   :  { %vm263_vm10 = vcmp.ge.f32.partialorder %v1368_v53, 0.0  ;;  %v332_v61 = vadd.f32 1.0, %v316_v17  ;;  %v524_v56 = vsub.f32 0.0, %v300_v29  ;;  %v1425_v34 = vmul.f32 0.70710677, %v1415_v8 }
 0x120   :  { %v504_v51 = vmul.f32 %v1331_v43, %v488_v30  ;;  %v1028_v57 = vpop.eup %1027  ;;  %v1428_v7 = vmul.f32 %v628_v35, %v1240_v33  ;;  %v613_v49 = vmul.f32 %v597_v48, %v1316_v24  ;;  %v422_v41 = vadd.f32 1.4214138, %v406_v60 }
 0x121   :  { %v314_v43 = vmul.f32 0.3275911, %v298_v20  ;;  %v1431_v1 = vpop.eup %1029  ;;  %1035 = vrcp.f32 %v332_v61  ;;  %v522_v23 = vsub.f32 0.0, %v298_v20  ;;  %v301_v58 = vand.u32 2147483647, %v1425_v34 }
 0x122   :  { %v584_v9 = vmul.f32 %v1028_v57, %v504_v51  ;;  %v438_v12 = vmul.f32 %v1394_v16, %v422_v41  ;;  %v377_v14 = vmul.f32 1.0614054, %v1431_v1  ;;  %v535_v26 = vmul.f32 %v519_v6, %v295_v28 }
 0x123   :  { %v330_v27 = vadd.f32 1.0, %v314_v43  ;;  %v1439_v33 = vsel %vm263_vm10, 1.0, %v1055_v5  ;;  %v540_v24 = vmul.f32 %v524_v56, %v300_v29  ;;  %v317_v31 = vmul.f32 0.3275911, %v301_v58 }
 0x124   :  { %v1443_v52 = vadd.f32 %v1151_v18, %v1252_v38  ;;  %v454_v55 = vadd.f32 -0.28449672, %v438_v12  ;;  %v393_v35 = vadd.f32 -1.4531521, %v377_v14  ;;  %v564_v48 = vmul.f32 1.442695, %v537_v21 }
 0x125   :  { %1037 = vrcp.f32 %v330_v27  ;;  %v1445_v30 = vpop.eup %1031  ;;  %v629_v39 = vadd.f32 1.0, %v613_v49  ;;  %v600_v28 = vsub.f32 1.0, %v584_v9  ;;  %v538_v17 = vmul.f32 %v522_v23, %v298_v20 }
 0x126   :  { %v333_v51 = vadd.f32 1.0, %v317_v31  ;;  %v470_v53 = vmul.f32 %v1394_v16, %v454_v55  ;;  %v409_v60 = vmul.f32 %v1431_v1, %v393_v35  ;;  %v375_v29 = vmul.f32 1.0614054, %v1445_v30 }
 0x127   :  { %v560_v6 = vmul.f32 1.442695, %v535_v26  ;;  %v1034_v61 = vpop.eup %1033  ;;  %v570_v18 = vmul.f32 1.442695, %v540_v24  ;;  %v525_v38 = vsub.f32 0.0, %v301_v58  ;;  %v654_v21 = vpack.c.bf16 %v1408_v54, %v1389_v62 }
 0x128   :  { %v1451_v56 = vmul.f32 0.70710677, %v1443_v52  ;;  %v486_v57 = vadd.f32 0.2548296, %v470_v53  ;;  %v425_v49 = vadd.f32 1.4214138, %v409_v60  ;;  %1039 = vpow2.f32 %v564_v48 }
 0x129   :  { %v391_v20 = vadd.f32 -1.4531521, %v375_v29  ;;  %v616_v41 = vmul.f32 %v600_v28, %v1355_v37  ;;  %v566_v43 = vmul.f32 1.442695, %v538_v17  ;;  %1041 = vrcp.f32 %v333_v51  ;;  %940 = vmatprep.mubr.bf16.mxu0 %v654_v21 }
 0x12a   :  { %v299_v9 = vand.u32 2147483647, %v1451_v56  ;;  %v502_v23 = vmul.f32 %v1394_v16, %v486_v57  ;;  %v441_v12 = vmul.f32 %v1431_v1, %v425_v49  ;;  %1043 = vpow2.f32 %v560_v6  ;;  %941 = vmatmul.mubr.bf16.vlgmr.msra.gmra.mrb[16].mxu0 %v655_v50 }
 0x12b   :  { %v407_v14 = vmul.f32 %v1445_v30, %v391_v20  ;;  %v1463_v62 = vpop.eup %1035  ;;  %v1466_v37 = vmul.f32 %v629_v39, %v1257_v44  ;;  %1045 = vpow2.f32 %v570_v18  ;;  %v541_v54 = vmul.f32 %v525_v38, %v301_v58 }
 0x12c   :  { %v315_v26 = vmul.f32 0.3275911, %v299_v9  ;;  %v582_v27 = vmul.f32 %v1034_v61, %v502_v23  ;;  %v457_v24 = vadd.f32 -0.28449672, %v441_v12  ;;  %v380_v31 = vmul.f32 1.0614054, %v1463_v62 }
 0x12d   :  { %v423_v16 = vadd.f32 1.4214138, %v407_v14  ;;  %v632_v55 = vadd.f32 1.0, %v616_v41  ;;  %1047 = vpow2.f32 %v566_v43  ;;  %v370_v48 = vmul.f32 1.0614054, %v1349_v2 }
 0x12e   :  { %v331_v35 = vadd.f32 1.0, %v315_v26  ;;  %v473_v63 = vmul.f32 %v1431_v1, %v457_v24  ;;  %v396_v50 = vadd.f32 -1.4531521, %v380_v31  ;;  %v523_v39 = vsub.f32 0.0, %v299_v9 }
 0x12f   :  { %v1470_v22 = vpop.eup %1037  ;;  %v439_v44 = vmul.f32 %v1445_v30, %v423_v16  ;;  %v572_v28 = vmul.f32 1.442695, %v541_v54  ;;  %v371_v17 = vmul.f32 1.0614054, %v1405_v32  ;;  %v598_v51 = vsub.f32 1.0, %v582_v27 }
 0x130   :  { %v378_v58 = vmul.f32 1.0614054, %v1470_v22  ;;  %1049 = vrcp.f32 %v331_v35  ;;  %v489_v53 = vadd.f32 0.2548296, %v473_v63  ;;  %v412_v29 = vmul.f32 %v1463_v62, %v396_v50 }
 0x131   :  { %v455_v60 = vadd.f32 -0.28449672, %v439_v44  ;;  %v1478_v6 = vmul.f32 %v632_v55, %v1343_v59  ;;  %v386_v18 = vadd.f32 -1.4531521, %v370_v48  ;;  %v387_v38 = vadd.f32 -1.4531521, %v371_v17 }
 0x132   :  { %v394_v61 = vadd.f32 -1.4531521, %v378_v58  ;;  %v1040_v21 = vpop.eup %1039  ;;  %v505_v57 = vmul.f32 %v1431_v1, %v489_v53  ;;  %v428_v20 = vadd.f32 1.4214138, %v412_v29  ;;  %v539_v41 = vmul.f32 %v523_v39, %v299_v9 }
 0x133   :  { %v471_v49 = vmul.f32 %v1445_v30, %v455_v60  ;;  %v1482_v43 = vpop.eup %1041  ;;  %v402_v12 = vmul.f32 %v1349_v2, %v386_v18  ;;  %v403_v14 = vmul.f32 %v1405_v32, %v387_v38  ;;  %v657_v59 = vpack.c.bf16 %v1466_v37, %v1428_v7 }
 0x134   :  { %v410_v23 = vmul.f32 %v1470_v22, %v394_v61  ;;  %v1044_v54 = vpop.eup %1043  ;;  %v585_v26 = vmul.f32 %v1040_v21, %v505_v57  ;;  %v444_v1 = vmul.f32 %v1463_v62, %v428_v20  ;;  %1051 = vpow2.f32 %v572_v28 }
 0x135   :  { %v487_v27 = vadd.f32 0.2548296, %v471_v49  ;;  %v1046_v24 = vpop.eup %1045  ;;  %v614_v9 = vmul.f32 %v598_v51, %v1381_v10  ;;  %v381_v31 = vmul.f32 1.0614054, %v1482_v43  ;;  %v418_v55 = vadd.f32 1.4214138, %v402_v12 }
 0x136   :  { %v426_v16 = vadd.f32 1.4214138, %v410_v23  ;;  %v601_v35 = vsub.f32 1.0, %v585_v26  ;;  %v460_v63 = vadd.f32 -0.28449672, %v444_v1  ;;  %vm268_vm13 = vcmp.ge.f32.partialorder %v1392_v15, 0.0 }
 0x137   :  { %v503_v48 = vmul.f32 %v1445_v30, %v487_v27  ;;  %v419_v44 = vadd.f32 1.4214138, %v403_v14  ;;  %v1048_v50 = vpop.eup %1047  ;;  %v397_v58 = vadd.f32 -1.4531521, %v381_v31  ;;  %v568_v17 = vmul.f32 1.442695, %v539_v41 }
 0x138   :  { %v442_v39 = vmul.f32 %v1470_v22, %v426_v16  ;;  %v434_v53 = vmul.f32 %v1349_v2, %v418_v55  ;;  %v617_v28 = vmul.f32 %v601_v35, %v1418_v42  ;;  %v476_v10 = vmul.f32 %v1463_v62, %v460_v63 }
 0x139   :  { %v583_v60 = vmul.f32 %v1044_v54, %v503_v48  ;;  %v435_v51 = vmul.f32 %v1405_v32, %v419_v44  ;;  %v630_v30 = vadd.f32 1.0, %v614_v9  ;;  %v413_v18 = vmul.f32 %v1482_v43, %v397_v58 }
 0x13a   :  { %v1498_v29 = vpop.eup %1049  ;;  %v458_v61 = vadd.f32 -0.28449672, %v442_v39  ;;  %v450_v38 = vadd.f32 -0.28449672, %v434_v53  ;;  %v633_v21 = vadd.f32 1.0, %v617_v28  ;;  %v231_v35 = vmul.f32 0.5, %v1362_v36 }
 0x13b   :  { %v599_v57 = vsub.f32 1.0, %v583_v60  ;;  %v492_v49 = vadd.f32 0.2548296, %v476_v10  ;;  %v379_v20 = vmul.f32 1.0614054, %v1498_v29  ;;  %v646_v58 = vmul.f32 %v630_v30, %v1376_v46 }
 0x13c   :  { %v474_v42 = vmul.f32 %v1470_v22, %v458_v61  ;;  %v429_v41 = vadd.f32 1.4214138, %v413_v18  ;;  %v451_v23 = vadd.f32 -0.28449672, %v435_v51  ;;  %v466_v12 = vmul.f32 %v1349_v2, %v450_v38 }
 0x13d   :  { %v1506_v14 = vmul.f32 %v633_v21, %v1397_v25  ;;  %v615_v54 = vmul.f32 %v599_v57, %v1439_v33  ;;  %v508_v26 = vmul.f32 %v1463_v62, %v492_v49  ;;  %v395_v27 = vadd.f32 -1.4531521, %v379_v20 }
 0x13e   :  { %v490_v1 = vadd.f32 0.2548296, %v474_v42  ;;  %v445_v9 = vmul.f32 %v1482_v43, %v429_v41  ;;  %v467_v16 = vmul.f32 %v1405_v32, %v451_v23  ;;  %v482_v31 = vadd.f32 0.2548296, %v466_v12  ;;  %v1052_v55 = vpop.eup %1051 }
 0x13f   :  { %v631_v48 = vadd.f32 1.0, %v615_v54  ;;  %v411_v63 = vmul.f32 %v1498_v29, %v395_v27  ;;  %v659_v25 = vpack.c.bf16 %v1506_v14, %v1478_v6  ;;  %v588_v44 = vmul.f32 %v1046_v24, %v508_v26 }
 0x140   :  { %v461_v33 = vadd.f32 -0.28449672, %v445_v9  ;;  %v483_v39 = vadd.f32 0.2548296, %v467_v16  ;;  %v498_v62 = vmul.f32 %v1349_v2, %v482_v31  ;;  %v506_v28 = vmul.f32 %v1470_v22, %v490_v1 }
 0x141   :  { %v647_v53 = vmul.f32 %v631_v48, %v231_v35  ;;  %v427_v60 = vadd.f32 1.4214138, %v411_v63  ;;  %1053 = vpow2.f32 %v568_v17  ;;  %v604_v61 = vsub.f32 1.0, %v588_v44 }
 0x142   :  { %v477_v10 = vmul.f32 %v1482_v43, %v461_v33  ;;  %v499_v36 = vmul.f32 %v1405_v32, %v483_v39  ;;  %v578_v51 = vmul.f32 %v1357_v11, %v498_v62  ;;  %v586_v18 = vmul.f32 %v1048_v50, %v506_v28 }
 0x143   :  { %v443_v24 = vmul.f32 %v1498_v29, %v427_v60  ;;  %v658_v2 = vpack.c.bf16 %v647_v53, %v646_v58  ;;  %v274_v32 = vsel %vm258_vm11, 1.0, %v1055_v5  ;;  %v284_v11 = vsel %vm268_vm13, 1.0, %v1055_v5 }
 0x144   :  { %v493_v46 = vadd.f32 0.2548296, %v477_v10  ;;  %v579_v30 = vmul.f32 %v1411_v40, %v499_v36  ;;  %v594_v22 = vsub.f32 1.0, %v578_v51  ;;  %vm266_vm14 = vcmp.ge.f32.partialorder %v1403_v0, 0.0 }
 0x145   :  { %v459_v38 = vadd.f32 -0.28449672, %v443_v24  ;;  %vm269_vm15 = vcmp.ge.f32.partialorder %v1425_v34, 0.0  ;;  %v275_v40 = vsel %vm259_vm12, 1.0, %v1055_v5  ;;  %v620_v50 = vmul.f32 %v604_v61, %v284_v11 }
 0x146   :  { %v509_v17 = vmul.f32 %v1482_v43, %v493_v46  ;;  %v595_v21 = vsub.f32 1.0, %v579_v30  ;;  %v610_v15 = vmul.f32 %v594_v22, %v274_v32  ;;  %v602_v42 = vsub.f32 1.0, %v586_v18 }
 0x147   :  { %v475_v57 = vmul.f32 %v1498_v29, %v459_v38  ;;  %v226_v43 = vmul.f32 0.5, %v1191_v3  ;;  %v227_v23 = vmul.f32 0.5, %v1261_v45  ;;  %v282_v34 = vsel %vm266_vm14, 1.0, %v1055_v5 }
 0x148   :  { %v589_v49 = vmul.f32 %v1052_v55, %v509_v17  ;;  %v611_v19 = vmul.f32 %v595_v21, %v275_v40  ;;  %v626_v20 = vadd.f32 1.0, %v610_v15  ;;  %v285_v54 = vsel %vm269_vm15, 1.0, %v1055_v5 }
 0x149   :  { %v491_v41 = vadd.f32 0.2548296, %v475_v57  ;;  %v636_v27 = vadd.f32 1.0, %v620_v50  ;;  %v618_v31 = vmul.f32 %v602_v42, %v282_v34  ;;  %vm267_vm1 = vcmp.ge.f32.partialorder %v1451_v56, 0.0 }
 0x14a   :  { %v605_v12 = vsub.f32 1.0, %v589_v49  ;;  %v627_v0 = vadd.f32 1.0, %v611_v19  ;;  %v642_v9 = vmul.f32 %v626_v20, %v226_v43  ;;  %v236_v3 = vmul.f32 0.5, %v1373_v4 }
 0x14b   :  { %v507_v26 = vmul.f32 %v1498_v29, %v491_v41  ;;  %v1054_v13 = vpop.eup %1053  ;;  %v237_v45 = vmul.f32 0.5, %v1415_v8  ;;  %v283_v29 = vsel %vm267_vm1, 1.0, %v1055_v5  ;;  %v634_v39 = vadd.f32 1.0, %v618_v31  ;;  %v869_v5 = vld [vmem:[%s1625_s4] ss:$0 sm:$0xff] }
 0x14c   :  { %v621_v1 = vmul.f32 %v605_v12, %v285_v54  ;;  %v643_v16 = vmul.f32 %v627_v0, %v227_v23  ;;  %v652_v44 = vmul.f32 %v636_v27, %v236_v3  ;;  %v234_v4 = vmul.f32 0.5, %v1385_v47 }
 0x14d   :  { %v587_v55 = vmul.f32 %v1054_v13, %v507_v26  ;;  %v235_v8 = vmul.f32 0.5, %v1443_v52 }
 0x14e   :  { %v637_v35 = vadd.f32 1.0, %v621_v1  ;;  %v656_v48 = vpack.c.bf16 %v643_v16, %v642_v9  ;;  %v650_v53 = vmul.f32 %v634_v39, %v234_v4 }
 0x14f   :  { %v603_v63 = vsub.f32 1.0, %v587_v55 }
 0x150   :  { %v653_v33 = vmul.f32 %v637_v35, %v237_v45  ;;  %944 = vmatprep.mubr.bf16.mxu1 %v656_v48 }
 0x151   :  { %v619_v62 = vmul.f32 %v603_v63, %v283_v29  ;;  %945 = vmatmul.mubr.bf16.vlgmr.msra.gmra.mrb[0].mxu1 %v657_v59 }
 0x152   :  { %948 = vmatprep.mubr.bf16.mxu1 %v658_v2  ;;  %v661_v56 = vpack.c.bf16 %v653_v33, %v652_v44 }
 0x153   :  { %v635_v58 = vadd.f32 1.0, %v619_v62 }
 0x155   :  { %v651_v28 = vmul.f32 %v635_v58, %v235_v8 }
 0x157   :  { %v660_v60 = vpack.c.bf16 %v651_v28, %v650_v53 }
 0x159   :  { %949 = vmatmul.mubr.bf16.gmra.mrb[4].mxu1 %v659_v25 }
 0x15a   :  { %952 = vmatprep.mubr.bf16.mxu1 %v660_v60 }
 0x161   :  { %953 = vmatmul.mubr.bf16.gmra.mrb[8].mxu1 %v661_v56 }
 0x1fd   :  { %v942_v7 = vpop.f32.mrb[16].mxu0 }
 0x1fe   :  { %v776_v37 = vadd.f32 %v942_v7, %v869_v5  ;;  %v767_v59 = vpop.f32.mrb[17].mxu0 }
 0x1ff   :  { %v768_v47 = vadd.f32 %v869_v5, %v767_v59  ;;  %v943_v10 = vpop.f32.mrb[18].mxu0 }
 0x200   :  { %832 = vst.msk [vmem:[%s1626_s5 + $0x10] sm:$0xff] %vm100_vm0, %v776_v37  ;;  %v779_v52 = vadd.f32 %v943_v10, %v869_v5  ;;  %v770_v36 = vpop.f32.mrb[19].mxu0 }
 0x201   :  { %830 = vst.msk [vmem:[%s1626_s5] sm:$0xff] %vm100_vm0, %v768_v47  ;;  %v771_v6 = vadd.f32 %v869_v5, %v770_v36 }
 0x202   :  { %833 = vst.msk [vmem:[%s1626_s5 + $0x18] sm:$0xff] %vm100_vm0, %v779_v52 }
 0x203   :  { %831 = vst.msk [vmem:[%s1626_s5 + $0x8] sm:$0xff] %vm100_vm0, %v771_v6 }
 0x224   :  { %v946_v14 = vpop.f32.mrb[0].mxu1 }
 0x225   :  { %v792_v25 = vadd.f32 %v946_v14, %v869_v5  ;;  %v783_v51 = vpop.f32.mrb[1].mxu1 }
 0x226   :  { %v784_v24 = vadd.f32 %v869_v5, %v783_v51  ;;  %v947_v2 = vpop.f32.mrb[2].mxu1 }
 0x227   :  { %836 = vst.msk [vmem:[%s1626_s5 + $0x30] sm:$0xff] %vm100_vm0, %v792_v25  ;;  %v795_v61 = vadd.f32 %v947_v2, %v869_v5  ;;  %v786_v46 = vpop.f32.mrb[3].mxu1 }
 0x228   :  { %834 = vst.msk [vmem:[%s1626_s5 + $0x20] sm:$0xff] %vm100_vm0, %v784_v24  ;;  %v787_v30 = vadd.f32 %v869_v5, %v786_v46 }
 0x229   :  { %837 = vst.msk [vmem:[%s1626_s5 + $0x38] sm:$0xff] %vm100_vm0, %v795_v61 }
 0x22a   :  { %835 = vst.msk [vmem:[%s1626_s5 + $0x28] sm:$0xff] %vm100_vm0, %v787_v30 }
 0x22c   :  { %v950_v22 = vpop.f32.mrb[4].mxu1 }
 0x22d   :  { %v808_v18 = vadd.f32 %v950_v22, %v869_v5  ;;  %v799_v38 = vpop.f32.mrb[5].mxu1 }
 0x22e   :  { %v800_v32 = vadd.f32 %v869_v5, %v799_v38  ;;  %v951_v11 = vpop.f32.mrb[6].mxu1 }
 0x22f   :  { %840 = vst.msk [vmem:[%s1626_s5 + $0x50] sm:$0xff] %vm100_vm0, %v808_v18  ;;  %v811_v17 = vadd.f32 %v951_v11, %v869_v5  ;;  %v802_v21 = vpop.f32.mrb[7].mxu1 }
 0x230   :  { %838 = vst.msk [vmem:[%s1626_s5 + $0x40] sm:$0xff] %vm100_vm0, %v800_v32  ;;  %v803_v15 = vadd.f32 %v869_v5, %v802_v21 }
 0x231   :  { %841 = vst.msk [vmem:[%s1626_s5 + $0x58] sm:$0xff] %vm100_vm0, %v811_v17 }
 0x232   :  { %839 = vst.msk [vmem:[%s1626_s5 + $0x48] sm:$0xff] %vm100_vm0, %v803_v15 }
 0x234   :  { %v954_v57 = vpop.f32.mrb[8].mxu1 }
 0x235   :  { %v824_v40 = vadd.f32 %v954_v57, %v869_v5  ;;  %v815_v50 = vpop.f32.mrb[9].mxu1 }
 0x236   :  { %v816_v49 = vadd.f32 %v869_v5, %v815_v50  ;;  %v955_v19 = vpop.f32.mrb[10].mxu1 }
 0x237   :  { %844 = vst.msk [vmem:[%s1626_s5 + $0x70] sm:$0xff] %vm100_vm0, %v824_v40  ;;  %v827_v20 = vadd.f32 %v955_v19, %v869_v5  ;;  %v818_v42 = vpop.f32.mrb[11].mxu1 }
 0x238   :  { %842 = vst.msk [vmem:[%s1626_s5 + $0x60] sm:$0xff] %vm100_vm0, %v816_v49  ;;  %v819_v41 = vadd.f32 %v869_v5, %v818_v42 }
 0x239   :  { %845 = vst.msk [vmem:[%s1626_s5 + $0x78] sm:$0xff] %vm100_vm0, %v827_v20 }
 0x23a   :  { %843 = vst.msk [vmem:[%s1626_s5 + $0x68] sm:$0xff] %vm100_vm0, %v819_v41 }

</bundles_post_ra>
